<compile_context>
chip_gen: v6e
topology: v6e:2x2x1
jax: 0.10.0
libtpu: 0.0.40
codegen_flags: <defaults>
</compile_context>

<pallas_src>
import math
from functools import lru_cache

import numpy as np
import jax
import jax.numpy as jnp
from jax.experimental import pallas as pl
from jax.experimental.pallas import tpu as pltpu

POOL_SCALES = (1, 2, 3, 6)


# ----------------------------------------------------------------------------
# Tiny separable pooling / interpolation operator matrices (numpy, cached).
# ----------------------------------------------------------------------------
def adaptive_pool_matrix(L, s):
    """(s, L) matrix implementing torch AdaptiveAvgPool1d(L -> s)."""
    m = np.zeros((s, L), np.float32)
    for i in range(s):
        start = (i * L) // s
        end = -((-(i + 1) * L) // s)          # ceil((i+1)*L/s)
        m[i, start:end] = 1.0 / float(end - start)
    return m


def bilinear_up_matrix(L, s):
    """(L, s) matrix implementing bilinear upsample s -> L, align_corners=True."""
    m = np.zeros((L, s), np.float32)
    if s == 1:
        m[:, 0] = 1.0
        return m
    for y in range(L):
        src = y * (s - 1) / (L - 1)
        i0 = min(int(math.floor(src)), s - 1)
        i1 = min(i0 + 1, s - 1)
        frac = src - i0
        m[y, i0] += 1.0 - frac
        m[y, i1] += frac
    return m


@lru_cache(maxsize=None)
def _ppm_operator_matrices(H, W, HW_pad, scales):
    """Packed P^T (HW_pad, PK) and stacked U^T (S, PK, HW_pad).

    Column/row block [off_s, off_s + s*s) belongs to scale s.  Rows of P^T
    beyond H*W and rows of each U^T outside its own block are zero; the zero
    U^T rows cancel whatever relu(W @ pooled + bias) puts in the foreign /
    padded z columns, so the result is exact.  Keep that invariant if the
    packing scheme ever changes.
    """
    HW = H * W
    ss = [s * s for s in scales]
    offs = np.concatenate([[0], np.cumsum(ss)]).astype(np.int64)
    PK = int(-(-int(offs[-1]) // 8) * 8)
    S = len(scales)
    pt = np.zeros((HW_pad, PK), np.float32)
    ut = np.zeros((S, PK, HW_pad), np.float32)
    for i, s in enumerate(scales):
        ph = adaptive_pool_matrix(H, s)
        pw = adaptive_pool_matrix(W, s)
        P = np.einsum("ih,jw->ijhw", ph, pw).reshape(s * s, HW)   # (ss, HW)
        uh = bilinear_up_matrix(H, s)
        uw = bilinear_up_matrix(W, s)
        U = np.einsum("yi,xj->yxij", uh, uw).reshape(HW, s * s)   # (HW, ss)
        o = int(offs[i])
        pt[:HW, o:o + s * s] = P.T
        ut[i, o:o + s * s, :HW] = U.T
    return pt, ut, PK


def _choose_hw_tile(HW, max_tile=1024):
    """HW tile: full HW if small, else the largest 128-multiple divisor."""
    if HW <= max_tile:
        return HW, 1
    best = None
    for tile in range(128, max_tile + 1, 128):
        if HW % tile == 0:
            best = tile
    if best is not None:
        return best, HW // best
    # No 128-multiple divisor: partial last tile.  OOB reads of x hit zero
    # rows of P^T (harmless); OOB output stores are masked by Pallas.
    tile = 512
    return tile, -(-HW // tile)


# ----------------------------------------------------------------------------
# Fused kernel: grid = (batch, output-channel-block, HW-tile).
# ----------------------------------------------------------------------------
def _make_kernel(nb_pass, C, PK, compute_dtype):
    def kernel(x_ref, pt_ref, w_ref, bias_ref, ut_ref, o_ref, pooled_ref, z_ref):
        b = pl.program_id(1)
        t = pl.program_id(2)

        @pl.when(b < nb_pass)
        def _pass_through():
            xb = x_ref[0]                                          # (OC, TILE)
            # Fused concat: this IS channel block b, HW tile t of the output.
            o_ref[0] = xb.astype(o_ref.dtype)
            # Packed pooling matmul (all 4 scales at once), accumulated over
            # HW tiles into the resident pooled scratch.
            part = jnp.dot(xb.astype(compute_dtype), pt_ref[...],
                           preferred_element_type=jnp.float32)     # (OC, PK)
            bc = jnp.minimum(b, nb_pass - 1)

            @pl.when(t == 0)
            def _():
                pooled_ref[bc] = part

            @pl.when(t > 0)
            def _():
                pooled_ref[bc] = pooled_ref[bc] + part

        @pl.when(b >= nb_pass)
        def _branch():
            bidx = jnp.maximum(b - nb_pass, 0)

            @pl.when(t == 0)
            def _():
                # 1x1 conv (BN scale folded into W) + BN bias + ReLU, once per
                # branch; pooled covers all of C by now.
                pooled = pooled_ref[...].reshape(C, PK).astype(compute_dtype)
                z = jnp.dot(w_ref[bidx], pooled,
                            preferred_element_type=jnp.float32)    # (OC, PK)
                z = jnp.maximum(z + bias_ref[bidx], 0.0)
                z_ref[...] = z.astype(z_ref.dtype)

            # Bilinear upsample of this HW tile; zero rows of U^T cancel the
            # foreign / padded z columns.
            up = jnp.dot(z_ref[...], ut_ref[0],
                         preferred_element_type=jnp.float32)        # (OC, TILE)
            o_ref[0] = up.astype(o_ref.dtype)

    return kernel


# ----------------------------------------------------------------------------
# Parameters + forward.
# ----------------------------------------------------------------------------
def init_params(key, fc_dim, out_ch):
    """Deterministic per-branch parameters (1x1 conv weight + eval-mode BN)."""
    params = []
    for i, _ in enumerate(POOL_SCALES):
        k = jax.random.fold_in(key, i)
        kw, kg, kb, km, kv = jax.random.split(k, 5)
        w = jax.random.normal(kw, (out_ch, fc_dim), jnp.float32) * 0.05
        gamma = jax.random.uniform(kg, (out_ch,), jnp.float32, 0.5, 1.5)
        beta = jax.random.normal(kb, (out_ch,), jnp.float32) * 0.1
        running_mean = jax.random.normal(km, (out_ch,), jnp.float32) * 0.1
        running_var = jax.random.uniform(kv, (out_ch,), jnp.float32, 0.5, 1.5)
        params.append((w, gamma, beta, running_mean, running_var))
    return params


def _padded_bytes(shape, itemsize):
    lead = int(np.prod(shape[:-2], dtype=np.int64)) if len(shape) > 2 else 1
    rows = -(-shape[-2] // 8) * 8
    cols = -(-shape[-1] // 128) * 128
    return int(lead * rows * cols * itemsize)


def ppm_bilinear_deepsup_forward(x, params, eps=1e-5, hw_tile=None,
                                 compute_dtype=jnp.bfloat16):
    """x: (N, C, H, W) NCHW.  Returns (N, C + 4*out_ch, H, W) in x.dtype."""
    N, C, H, W = x.shape
    OC = params[0][0].shape[0]
    S = len(POOL_SCALES)
    assert C % OC == 0 and C // OC >= 1, "fc_dim must be a multiple of branch width"
    assert OC % 8 == 0, "branch width must be a multiple of 8 (sublane tiling)"
    nb_pass = C // OC
    NB = nb_pass + S
    HW = H * W

    if hw_tile is None:
        TILE, T = _choose_hw_tile(HW)
    else:
        TILE = int(hw_tile)
        assert TILE == HW or TILE % 128 == 0
        T = -(-HW // TILE)
    HW_pad = T * TILE
    last_t = T - 1

    # No wrapper-side padding of x / slicing of the output (only the tiny
    # operator matrices are padded to T*TILE).
    x2 = x.reshape(N, C, HW)

    pt_np, ut_np, PK = _ppm_operator_matrices(H, W, HW_pad, POOL_SCALES)
    pt_all = jnp.asarray(pt_np).astype(compute_dtype)              # (HW_pad, PK)
    ut_all = jnp.asarray(ut_np).astype(compute_dtype)              # (S, PK, HW_pad)

    # Fold eval-mode BN scale into the 1x1-conv weights; only the bias enters.
    w_list, bias_list = [], []
    for (w, gamma, beta, rmean, rvar) in params:
        inv = gamma / jnp.sqrt(rvar + eps)
        w_list.append((w * inv[:, None]).astype(compute_dtype))
        bias_list.append((beta - rmean * inv)[:, None].astype(jnp.float32))
    w_all = jnp.stack(w_list)                                       # (S, OC, C)
    bias_all = jnp.stack(bias_list)                                 # (S, OC, 1)

    kernel = _make_kernel(nb_pass, C, PK, compute_dtype)

    cd_size = jnp.dtype(compute_dtype).itemsize
    x_size = jnp.dtype(x.dtype).itemsize

    # --- index maps -------------------------------------------------------
    # x / P^T indices are frozen at their last pass-through value during the
    # branch steps, and the branch weights/biases use a constant index, so
    # nothing is re-DMA'd while the branches run.
    def x_map(n, b, t):
        return (n, jnp.minimum(b, nb_pass - 1), jnp.where(b < nb_pass, t, last_t))

    def pt_map(n, b, t):
        return (jnp.where(b < nb_pass, t, last_t), 0)

    def const_map(n, b, t):
        return (0, 0, 0)

    def ut_map(n, b, t):
        return (jnp.maximum(b - nb_pass, 0), 0, jnp.where(b >= nb_pass, t, 0))

    def out_map(n, b, t):
        return (n, b, t)

    in_specs = [
        pl.BlockSpec((1, OC, TILE), x_map),
        pl.BlockSpec((TILE, PK), pt_map),
        pl.BlockSpec((S, OC, C), const_map),     # resident branch weights
        pl.BlockSpec((S, OC, 1), const_map),     # resident BN biases
        pl.BlockSpec((1, PK, TILE), ut_map),
    ]
    out_specs = pl.BlockSpec((1, OC, TILE), out_map)

    scratch_shapes = [
        pltpu.VMEM((nb_pass, OC, PK), jnp.float32),   # packed pooled activations
        pltpu.VMEM((OC, PK), compute_dtype),          # per-branch conv+BN+ReLU
    ]

    # --- generation-aware VMEM limit ---------------------------------------
    vmem_est = 2 * (_padded_bytes((1, OC, TILE), x_size)
                    + _padded_bytes((TILE, PK), cd_size)
                    + _padded_bytes((S, OC, C), cd_size)
                    + _padded_bytes((S, OC, 1), 4)
                    + _padded_bytes((1, PK, TILE), cd_size)
                    + _padded_bytes((1, OC, TILE), x_size))
    vmem_est += _padded_bytes((nb_pass, OC, PK), 4) + _padded_bytes((OC, PK), cd_size)
    try:
        vmem_cap = int(pltpu.get_tpu_info().vmem_capacity_bytes)
    except Exception:
        vmem_cap = 64 << 20            # most conservative generation (v7x per-TC)
    vmem_limit = None
    if vmem_est > (16 << 20):          # above the smallest default scoped limit
        vmem_limit = min(int(vmem_est * 5 // 4), int(vmem_cap * 3 // 4))

    # Advisory cost: one packed pooling matmul per n, tiny conv, per-tile upsample.
    flops = N * (2 * C * HW * PK) + N * S * (2 * OC * C * PK + 2 * OC * PK * HW)
    bytes_accessed = (x2.size * x_size + N * (C + S * OC) * HW * x_size
                      + (pt_all.size + ut_all.size + w_all.size) * cd_size
                      + bias_all.size * 4)

    out2 = pl.pallas_call(
        kernel,
        out_shape=jax.ShapeDtypeStruct((N, C + S * OC, HW), x.dtype),
        grid_spec=pltpu.PrefetchScalarGridSpec(
            num_scalar_prefetch=0,
            grid=(N, NB, T),
            in_specs=in_specs,
            out_specs=out_specs,
            scratch_shapes=scratch_shapes,
        ),
        compiler_params=pltpu.CompilerParams(
            dimension_semantics=("parallel", "arbitrary", "arbitrary"),
            vmem_limit_bytes=vmem_limit,
        ),
        cost_estimate=pl.CostEstimate(
            flops=int(flops), transcendentals=0, bytes_accessed=int(bytes_accessed)),
    )(x2, pt_all, w_all, bias_all, ut_all)

    return out2.reshape(N, C + S * OC, H, W)


# ----------------------------------------------------------------------------
# Plain-JAX f32 reference (same linear-operator formulation, unfused).
# ----------------------------------------------------------------------------
def reference_forward(x, params, eps=1e-5):
    N, C, H, W = x.shape
    HW = H * W
    x2 = x.reshape(N, C, HW)
    outs = [x]
    for scale, (w, gamma, beta, rmean, rvar) in zip(POOL_SCALES, params):
        ph = adaptive_pool_matrix(H, scale)
        pw = adaptive_pool_matrix(W, scale)
        P = np.einsum("ih,jw->ijhw", ph, pw).reshape(scale * scale, HW)
        uh = bilinear_up_matrix(H, scale)
        uw = bilinear_up_matrix(W, scale)
        U = np.einsum("yi,xj->yxij", uh, uw).reshape(HW, scale * scale)
        pt = jnp.asarray(P.T)
        ut = jnp.asarray(U.T)
        inv = gamma / jnp.sqrt(rvar + eps)
        bn_scale = inv.reshape(1, -1, 1)
        bn_bias = (beta - rmean * inv).reshape(1, -1, 1)
        pooled = jnp.einsum("ncx,xs->ncs", x2, pt)
        z = jnp.einsum("oc,ncs->nos", w, pooled)
        z = jax.nn.relu(z * bn_scale + bn_bias)
        y2 = jnp.einsum("nos,sx->nox", z, ut)
        outs.append(y2.reshape(N, -1, H, W))
    return jnp.concatenate(outs, axis=1)


if __name__ == "__main__":
    # Small shapes consistent with the module (fc_dim scaled down from 4096,
    # branch channels scaled down from 512).
    N, FC_DIM, OUT_CH, H, W = 2, 32, 16, 16, 16

    key = jax.random.PRNGKey(0)
    kx, kp = jax.random.split(key)
    x = jax.random.normal(kx, (N, FC_DIM, H, W), jnp.float32)
    params = init_params(kp, FC_DIM, OUT_CH)

    ref = jax.block_until_ready(reference_forward(x, params))
    expected_shape = (N, FC_DIM + len(POOL_SCALES) * OUT_CH, H, W)

    # Exercise both the single-tile (TILE == HW) and multi-tile (TILE=128, T=2)
    # paths of the HW-tiled pipeline.
    for hw_tile in (None, 128):
        out = jax.block_until_ready(
            ppm_bilinear_deepsup_forward(x, params, hw_tile=hw_tile))
        assert out.shape == expected_shape, out.shape
        # pass-through (concat) channels are copied exactly in x.dtype
        assert jnp.array_equal(out[:, :FC_DIM], x), "pass-through mismatch"
        # PPM branch channels: bf16 matmuls with f32 accumulation
        assert jnp.allclose(out, ref, atol=2e-2, rtol=2e-2), (
            f"mismatch vs reference (hw_tile={hw_tile})")

    print("KERNEL_OK")
</pallas_src>

<mosaic_0001>
module attributes {stable_mosaic.version = 11 : i64} {
  func.func @kernel(%arg0: i32, %arg1: i32, %arg2: i32, %arg3: memref<1x16x256xf32, #tpu.memory_space<vmem>>, %arg4: memref<256x56xbf16, #tpu.memory_space<vmem>>, %arg5: memref<4x16x32xbf16, #tpu.memory_space<vmem>>, %arg6: memref<4x16x1xf32, #tpu.memory_space<vmem>>, %arg7: memref<1x56x256xbf16, #tpu.memory_space<vmem>>, %arg8: memref<1x16x256xf32, #tpu.memory_space<vmem>>, %arg9: memref<2x16x56xf32, #tpu.memory_space<vmem>>, %arg10: memref<16x56xbf16, #tpu.memory_space<vmem>>) attributes {dimension_semantics = [#tpu.dimension_semantics<parallel>, #tpu.dimension_semantics<arbitrary>, #tpu.dimension_semantics<arbitrary>], iteration_bounds = array<i64: 2, 6, 1>, scalar_prefetch = 0 : i64, scratch_operands = 2 : i64, tpu.core_type = #tpu.core_type<tc>, window_params = [{transform_indices = @transform_0, window_bounds = array<i64: 1, 16, 256>}, {transform_indices = @transform_1, window_bounds = array<i64: 256, 56>}, {pipeline_mode = #tpu.pipeline_mode<synchronous>, transform_indices = @transform_2, window_bounds = array<i64: 4, 16, 32>}, {pipeline_mode = #tpu.pipeline_mode<synchronous>, transform_indices = @transform_3, window_bounds = array<i64: 4, 16, 1>}, {transform_indices = @transform_4, window_bounds = array<i64: 1, 56, 256>}, {transform_indices = @transform_5, window_bounds = array<i64: 1, 16, 256>}]} {
    %c2_i32 = arith.constant 2 : i32
    %0 = arith.cmpi slt, %arg1, %c2_i32 : i32
    %1 = arith.extui %0 : i1 to i32
    %c0_i32 = arith.constant 0 : i32
    %2 = arith.cmpi ne, %1, %c0_i32 : i32
    scf.if %2 {
      %c0 = arith.constant 0 : index
      %c0_2 = arith.constant 0 : index
      %c0_3 = arith.constant 0 : index
      %6 = vector.load %arg3[%c0, %c0_2, %c0_3] : memref<1x16x256xf32, #tpu.memory_space<vmem>>, vector<1x16x256xf32>
      %7 = vector.shape_cast %6 : vector<1x16x256xf32> to vector<16x256xf32>
      %c0_4 = arith.constant 0 : index
      %c0_5 = arith.constant 0 : index
      %c0_6 = arith.constant 0 : index
      %8 = vector.load %arg8[%c0_4, %c0_5, %c0_6] : memref<1x16x256xf32, #tpu.memory_space<vmem>>, vector<1x16x256xf32>
      %9 = vector.shape_cast %8 : vector<1x16x256xf32> to vector<16x256xf32>
      %10 = vector.shape_cast %7 : vector<16x256xf32> to vector<1x16x256xf32>
      tpu.vector_store %arg8[%c0_4, %c0_5, %c0_6], %10 {strides = array<i32>} : memref<1x16x256xf32, #tpu.memory_space<vmem>>, vector<1x16x256xf32>,
      %11 = arith.truncf %7 : vector<16x256xf32> to vector<16x256xbf16>
      %c0_7 = arith.constant 0 : index
      %c0_8 = arith.constant 0 : index
      %12 = vector.load %arg4[%c0_7, %c0_8] : memref<256x56xbf16, #tpu.memory_space<vmem>>, vector<256x56xbf16>
      %cst = arith.constant dense<0.000000e+00> : vector<16x56xf32>
      %13 = tpu.matmul %11, %12, %cst {dimension_numbers = #tpu.dot_dimension_numbers<[1], [0], [0], [1], [0, 0, 1, 1], [], []>} : vector<16x256xbf16>, vector<256x56xbf16>, vector<16x56xf32> -> vector<16x56xf32>
      %c1_i32 = arith.constant 1 : i32
      %14 = arith.minsi %arg1, %c1_i32 : i32
      %c0_i32_9 = arith.constant 0 : i32
      %15 = arith.cmpi eq, %arg2, %c0_i32_9 : i32
      %16 = arith.extui %15 : i1 to i32
      %c0_i32_10 = arith.constant 0 : i32
      %17 = arith.cmpi ne, %16, %c0_i32_10 : i32
      scf.if %17 {
        %21 = arith.index_cast %14 : i32 to index
        %c0_13 = arith.constant 0 : index
        %c0_14 = arith.constant 0 : index
        %22 = vector.load %arg9[%21, %c0_13, %c0_14] : memref<2x16x56xf32, #tpu.memory_space<vmem>>, vector<1x16x56xf32>
        %23 = vector.shape_cast %22 : vector<1x16x56xf32> to vector<16x56xf32>
        %24 = vector.shape_cast %13 : vector<16x56xf32> to vector<1x16x56xf32>
        tpu.vector_store %arg9[%21, %c0_13, %c0_14], %24 {strides = array<i32>} : memref<2x16x56xf32, #tpu.memory_space<vmem>>, vector<1x16x56xf32>,
      } else {
      }
      %c0_i32_11 = arith.constant 0 : i32
      %18 = arith.cmpi sgt, %arg2, %c0_i32_11 : i32
      %19 = arith.extui %18 : i1 to i32
      %c0_i32_12 = arith.constant 0 : i32
      %20 = arith.cmpi ne, %19, %c0_i32_12 : i32
      scf.if %20 {
        %21 = arith.index_cast %14 : i32 to index
        %c0_13 = arith.constant 0 : index
        %c0_14 = arith.constant 0 : index
        %22 = vector.load %arg9[%21, %c0_13, %c0_14] : memref<2x16x56xf32, #tpu.memory_space<vmem>>, vector<1x16x56xf32>
        %23 = vector.shape_cast %22 : vector<1x16x56xf32> to vector<16x56xf32>
        %24 = arith.addf %23, %13 : vector<16x56xf32>
        %25 = arith.index_cast %14 : i32 to index
        %c0_15 = arith.constant 0 : index
        %c0_16 = arith.constant 0 : index
        %26 = vector.load %arg9[%25, %c0_15, %c0_16] : memref<2x16x56xf32, #tpu.memory_space<vmem>>, vector<1x16x56xf32>
        %27 = vector.shape_cast %26 : vector<1x16x56xf32> to vector<16x56xf32>
        %28 = vector.shape_cast %24 : vector<16x56xf32> to vector<1x16x56xf32>
        tpu.vector_store %arg9[%25, %c0_15, %c0_16], %28 {strides = array<i32>} : memref<2x16x56xf32, #tpu.memory_space<vmem>>, vector<1x16x56xf32>,
      } else {
      }
    } else {
    }
    %c2_i32_0 = arith.constant 2 : i32
    %3 = arith.cmpi sge, %arg1, %c2_i32_0 : i32
    %4 = arith.extui %3 : i1 to i32
    %c0_i32_1 = arith.constant 0 : i32
    %5 = arith.cmpi ne, %4, %c0_i32_1 : i32
    scf.if %5 {
      %c2_i32_2 = arith.constant 2 : i32
      %6 = arith.subi %arg1, %c2_i32_2 : i32
      %c0_i32_3 = arith.constant 0 : i32
      %7 = arith.maxsi %6, %c0_i32_3 : i32
      %c0_i32_4 = arith.constant 0 : i32
      %8 = arith.cmpi eq, %arg2, %c0_i32_4 : i32
      %9 = arith.extui %8 : i1 to i32
      %c0_i32_5 = arith.constant 0 : i32
      %10 = arith.cmpi ne, %9, %c0_i32_5 : i32
      scf.if %10 {
        %c0_13 = arith.constant 0 : index
        %c0_14 = arith.constant 0 : index
        %c0_15 = arith.constant 0 : index
        %18 = vector.load %arg9[%c0_13, %c0_14, %c0_15] : memref<2x16x56xf32, #tpu.memory_space<vmem>>, vector<2x16x56xf32>
        %19 = vector.shape_cast %18 : vector<2x16x56xf32> to vector<32x56xf32>
        %20 = arith.truncf %19 : vector<32x56xf32> to vector<32x56xbf16>
        %21 = arith.index_cast %7 : i32 to index
        %c0_16 = arith.constant 0 : index
        %c0_17 = arith.constant 0 : index
        %22 = vector.load %arg5[%21, %c0_16, %c0_17] : memref<4x16x32xbf16, #tpu.memory_space<vmem>>, vector<1x16x32xbf16>
        %23 = vector.shape_cast %22 : vector<1x16x32xbf16> to vector<16x32xbf16>
        %cst_18 = arith.constant dense<0.000000e+00> : vector<16x56xf32>
        %24 = tpu.matmul %23, %20, %cst_18 {dimension_numbers = #tpu.dot_dimension_numbers<[1], [0], [0], [1], [0, 0, 1, 1], [], []>} : vector<16x32xbf16>, vector<32x56xbf16>, vector<16x56xf32> -> vector<16x56xf32>
        %25 = arith.index_cast %7 : i32 to index
        %c0_19 = arith.constant 0 : index
        %c0_20 = arith.constant 0 : index
        %26 = vector.load %arg6[%25, %c0_19, %c0_20] : memref<4x16x1xf32, #tpu.memory_space<vmem>>, vector<1x16x1xf32>
        %27 = vector.shape_cast %26 : vector<1x16x1xf32> to vector<16x1xf32>
        %28 = vector.broadcast %27 : vector<16x1xf32> to vector<16x56xf32>
        %29 = arith.addf %24, %28 : vector<16x56xf32>
        %cst_21 = arith.constant 0.000000e+00 : f32
        %30 = vector.broadcast %cst_21 : f32 to vector<16x56xf32>
        %31 = arith.maximumf %29, %30 : vector<16x56xf32>
        %32 = arith.truncf %31 : vector<16x56xf32> to vector<16x56xbf16>
        %c0_22 = arith.constant 0 : index
        %c0_23 = arith.constant 0 : index
        %33 = vector.load %arg10[%c0_22, %c0_23] : memref<16x56xbf16, #tpu.memory_space<vmem>>, vector<16x56xbf16>
        tpu.vector_store %arg10[%c0_22, %c0_23], %32 {strides = array<i32>} : memref<16x56xbf16, #tpu.memory_space<vmem>>, vector<16x56xbf16>,
      } else {
      }
      %c0 = arith.constant 0 : index
      %c0_6 = arith.constant 0 : index
      %11 = vector.load %arg10[%c0, %c0_6] : memref<16x56xbf16, #tpu.memory_space<vmem>>, vector<16x56xbf16>
      %c0_7 = arith.constant 0 : index
      %c0_8 = arith.constant 0 : index
      %c0_9 = arith.constant 0 : index
      %12 = vector.load %arg7[%c0_7, %c0_8, %c0_9] : memref<1x56x256xbf16, #tpu.memory_space<vmem>>, vector<1x56x256xbf16>
      %13 = vector.shape_cast %12 : vector<1x56x256xbf16> to vector<56x256xbf16>
      %cst = arith.constant dense<0.000000e+00> : vector<16x256xf32>
      %14 = tpu.matmul %11, %13, %cst {dimension_numbers = #tpu.dot_dimension_numbers<[1], [0], [0], [1], [0, 0, 1, 1], [], []>} : vector<16x56xbf16>, vector<56x256xbf16>, vector<16x256xf32> -> vector<16x256xf32>
      %c0_10 = arith.constant 0 : index
      %c0_11 = arith.constant 0 : index
      %c0_12 = arith.constant 0 : index
      %15 = vector.load %arg8[%c0_10, %c0_11, %c0_12] : memref<1x16x256xf32, #tpu.memory_space<vmem>>, vector<1x16x256xf32>
      %16 = vector.shape_cast %15 : vector<1x16x256xf32> to vector<16x256xf32>
      %17 = vector.shape_cast %14 : vector<16x256xf32> to vector<1x16x256xf32>
      tpu.vector_store %arg8[%c0_10, %c0_11, %c0_12], %17 {strides = array<i32>} : memref<1x16x256xf32, #tpu.memory_space<vmem>>, vector<1x16x256xf32>,
    } else {
    }
    return
  }
  func.func @transform_0(%arg0: i32, %arg1: i32, %arg2: i32) -> (i32, i32, i32) {
    %c1_i32 = arith.constant 1 : i32
    %0 = arith.minsi %arg1, %c1_i32 : i32
    %c2_i32 = arith.constant 2 : i32
    %1 = arith.cmpi slt, %arg1, %c2_i32 : i32
    %c0_i32 = arith.constant 0 : i32
    %2 = arith.select %1, %arg2, %c0_i32 : i32
    %c0_i32_0 = arith.constant 0 : i32
    return %arg0, %0, %2 : i32, i32, i32
  }
  func.func @transform_1(%arg0: i32, %arg1: i32, %arg2: i32) -> (i32, i32) {
    %c2_i32 = arith.constant 2 : i32
    %0 = arith.cmpi slt, %arg1, %c2_i32 : i32
    %c0_i32 = arith.constant 0 : i32
    %1 = arith.select %0, %arg2, %c0_i32 : i32
    %c0_i32_0 = arith.constant 0 : i32
    %c0_i32_1 = arith.constant 0 : i32
    return %1, %c0_i32_0 : i32, i32
  }
  func.func @transform_2(%arg0: i32, %arg1: i32, %arg2: i32) -> (i32, i32, i32) {
    %c0_i32 = arith.constant 0 : i32
    %c0_i32_0 = arith.constant 0 : i32
    %c0_i32_1 = arith.constant 0 : i32
    %c0_i32_2 = arith.constant 0 : i32
    return %c0_i32, %c0_i32_0, %c0_i32_1 : i32, i32, i32
  }
  func.func @transform_3(%arg0: i32, %arg1: i32, %arg2: i32) -> (i32, i32, i32) {
    %c0_i32 = arith.constant 0 : i32
    %c0_i32_0 = arith.constant 0 : i32
    %c0_i32_1 = arith.constant 0 : i32
    %c0_i32_2 = arith.constant 0 : i32
    return %c0_i32, %c0_i32_0, %c0_i32_1 : i32, i32, i32
  }
  func.func @transform_4(%arg0: i32, %arg1: i32, %arg2: i32) -> (i32, i32, i32) {
    %c2_i32 = arith.constant 2 : i32
    %0 = arith.subi %arg1, %c2_i32 : i32
    %c0_i32 = arith.constant 0 : i32
    %1 = arith.maxsi %0, %c0_i32 : i32
    %c2_i32_0 = arith.constant 2 : i32
    %2 = arith.cmpi sge, %arg1, %c2_i32_0 : i32
    %c0_i32_1 = arith.constant 0 : i32
    %3 = arith.select %2, %arg2, %c0_i32_1 : i32
    %c0_i32_2 = arith.constant 0 : i32
    %c0_i32_3 = arith.constant 0 : i32
    return %1, %c0_i32_2, %3 : i32, i32, i32
  }
  func.func @transform_5(%arg0: i32, %arg1: i32, %arg2: i32) -> (i32, i32, i32) {
    %c0_i32 = arith.constant 0 : i32
    return %arg0, %arg1, %arg2 : i32, i32, i32
  }
}

</mosaic_0001>

<bundles_post_ra>
// kernel: tpu_custom_call.1
= control target key start
LH: loop header
LB: loop body
LE: loop exit
PB: predicated region body
PF: predicated region fallthrough
CT: control target
= control target key end

     0   :  { %10 = vsyncpa [#allocation5], 0  ;;  %s1712_s0 = inlined_call_operand.hbm [shape: f32[2,32,256], index: 0, kind: input, shape index: {}]   ;;  %s1713_s1 = inlined_call_operand.vmem [shape: bf16[256,56], index: 1, kind: input, shape index: {}]   ;;  %s1714_s2 = inlined_call_operand.vmem [shape: bf16[4,16,32], index: 2, kind: input, shape index: {}]   ;;  %s1715_s3 = inlined_call_operand.vmem [shape: f32[4,16,1], index: 3, kind: input, shape index: {}]   ;;  %s1716_s4 = inlined_call_operand.vmem [shape: bf16[4,56,256], index: 4, kind: input, shape index: {}]   ;;  %s1717_s5 = inlined_call_operand.hbm [shape: f32[2,96,256], index: 5, kind: output, shape index: {}]  }
   0x1   :  { %12 = vsyncpa [#allocation5 + $0x1], 0 }
   0x2   :  { %13 = vsyncpa [#allocation6], 0 }
   0x3   :  { %15 = vsyncpa [#allocation6 + $0x1], 0  ;;  %s1407_s18 = smov 0   ;;  %s1409_s19 = smov 0  }
   0x4   :  { %s1411_s20 = smov 0   ;;  %s1413_s21 = smov 0  }
   0x5   :  { %s1415_s22 = smov 0   ;;  %s1417_s23 = smov 0  }
   0x6   :  { %s1419_s24 = smov 0   ;;  %s1421_s25 = smov 0  }
   0x7   :  { %s1423_s26 = smov 0   ;;  %s1425_s27 = smov 0  }
   0x8   :  { %s1427_s28 = smov 0  }
   0x9 LB: > { %1723 = sst [smem:[#allocation10_spill]] %s1334_s20  ;;  %s970_s29 = sadd.s32 4294967295, %s1366_s28   ;;  %s1366_s28 = sphi %s1427_s28, %s21_s28   ;;  %s1362_s27 = sphi %s1425_s27, %s1749_s27   ;;  %s1358_s26 = sphi %s1423_s26, %s1741_s26   ;;  %s1354_s25 = sphi %s1421_s25, %s1748_s25   ;;  %s1350_s24 = sphi %s1419_s24, %s1740_s24   ;;  %s1346_s23 = sphi %s1417_s23, %s1747_s23   ;;  %s1342_s22 = sphi %s1415_s22, %s1746_s22   ;;  %s1338_s21 = sphi %s1413_s21, %s1745_s21   ;;  %s1334_s20 = sphi %s1411_s20, %s1738_s20   ;;  %s1330_s19 = sphi %s1409_s19, %s1744_s19   ;;  %s1326_s18 = sphi %s1407_s18, %s1743_s18  }
   0xa   : > { %1724 = sst [smem:[#allocation11_spill]] %s1358_s26  ;;  %s36_s6 = sadd.s32 1, %s1358_s26 }
   0xb   : > { %s40_s7 = sadd.s32 1, %s1362_s27  ;;  %p38_p0 = scmp.ge.s32.totalorder %s36_s6, 6 }
   0xc   : > { %p44_p1 = scmp.lt.s32.totalorder %s1358_s26, 1  ;;  %s59_s8 = sadd.s32 1, %s1346_s23 }
   0xd   : > { %p66_p2 = scmp.ne.s32.totalorder %s1346_s23, %s1342_s22  ;;  %s1751_s6 = smov (%p38_p0, %s36_s6), 0 }
   0xe   : > { %1725 = sst [smem:[#allocation12_spill]] %s1751_s6  ;;  %s1753_s7 = smov (!%p38_p0, %s40_s7), %s1362_s27 }
   0xf   : > { %s1474_s9 = scalar_select %p44_p1, %s1358_s26, 1 }
  0x10   : > { %p42_p3 = scmp.ge.s32.totalorder %s1753_s7, 2  ;;  %p48_p4 = scmp.lt.s32.totalorder %s1751_s6, 1 }
  0x11   : > { %p67_p5 = scmp.eq.s32.totalorder %s1366_s28, 0  ;;  %p72_p6 = scmp.ne.s32.totalorder %s1342_s22, %s1338_s21 }
  0x12   : > { %s1755_s7 = smov (%p42_p3, %s1753_s7), 0  ;;  %p73_p8 = scmp.eq.s32.totalorder %s970_s29, 0 }
  0x13   : > { %1726 = sst [smem:[#allocation13_spill]] %s1755_s7  ;;  %s52_s11 = ssub.s32 %s1362_s27, %s1755_s7 }
  0x14   : > { %s49_s10 = scalar_select %p48_p4, %s1751_s6, 1 }
  0x15   : > { %p1485_p7 = por %p67_p5, %p66_p2  ;;  %s193_s15 = ssub.s32 %s1358_s26, %s1751_s6 }
  0x16   : > { %s53_s13 = ssub.s32 %s1474_s9, %s49_s10  ;;  %p1494_p10 = por %p73_p8, %p72_p6 }
  0x17   : > { %s54_s14 = sor.u32 %s53_s13, %s52_s11  ;;  %s194_s17 = sor.u32 %s193_s15, %s52_s11 }
  0x18   : > { %p57_p9 = scmp.eq.s32.totalorder %s54_s14, 0  ;;  %s199_s21 = sadd.s32 1, %s1334_s20 }
  0x19   : > { %p197_p11 = scmp.eq.s32.totalorder %s194_s17, 0  ;;  %p209_p12 = scmp.ne.s32.totalorder %s1334_s20, %s1330_s19 }
  0x1a   : > { %s1500_s30 = scalar_select %p57_p9, %s1346_s23, %s59_s8  }
  0x1b   : > { %p210_p13 = scmp.eq.s32.totalorder %s970_s29, 11  ;;  %p215_p0 = scmp.ne.s32.totalorder %s1330_s19, %s1326_s18 }
  0x1c   : > { %1729 = sst [smem:[#allocation14_spill]] %s1500_s30  ;;  %s1732_s14 = sadd.s32 4294967294, %s1366_s28  }
  0x1d   : > { %s1509_s10 = scalar_select %p197_p11, %s1334_s20, %s199_s21  }
  0x1e   : > { %p1511_p1 = por %p210_p13, %p209_p12  ;;  %p216_p2 = scmp.eq.s32.totalorder %s1732_s14, 11 }
  0x1f   : > { %1730 = sst [smem:[#allocation15_spill]] %s1509_s10  ;;  %p1091_p3 = scmp.lt.s32.totalorder %s1366_s28, 12 }
  0x20   : > { %p1518_p4 = por %p216_p2, %p215_p0  ;;  %s242_s8 = sand.u32 1, %s1346_s23  }
  0x21   : > { %s976_s15 = sshll.u32 %s242_s8, 5  ;;  %s1037_s17 = sshll.u32 %s1474_s9, 2 }
  0x22   : > { %s1733_s11 = scalar_select %p1518_p4, 1, 0 }
  0x23   : > { %s979_s7 = sshll.u32 %s1362_s27, 3  ;;  %s246_s29 = scalar_lea.vmem [#allocation4], %s976_s15 }
  0x24   : > { %1734 = sst [smem:[#allocation16_spill]] %s1733_s11  ;;  %s262_s6 = sshll.u32 %s246_s29, 4  ;;  %s263_s6 = int_to_ptr.vmem [resolvable:$true] %s262_s6 }
  0x25   : > { %s259_s26 = sadd.s32 %s1037_s17, %s979_s7  ;;  %p1527_p5 = pnand %p1091_p3, %p1485_p7 }
  0x26   : > { %s980_s21 = sshll.u32 %s259_s26, 7  ;;  %s243_s11 = scalar_lea.sflag [#allocation5], %s242_s8 }
  0x27   : > { %s261_s20 = scalar_lea.hbm %s1712_s0, %s980_s21  ;;  %p1220_p6 = pneg %p1527_p5 }
  0x28   : > { %s1231_s9 = scalar_lea.vmem %s263_s6, 512  ;;  %s1368_s7 = smov [#allocation4]  }
  0x29   : > { %p1232_p8 = scmp.ne.s32.totalorder %s263_s6, %s1231_s9  ;;  %s1236_s15 = sshll.u32 %s1368_s7, 4  ;;  %s1237_s15 = int_to_ptr.vmem [resolvable:$false] %s1236_s15 }
  0x2a   : > { %s1238_s26 = scalar_lea.vmem %s1237_s15, 1024  ;;  %p1239_p7 = scmp.lt.s32.totalorder %s263_s6, %s1237_s15 }
  0x2b   : > { %p1234_p9 = pnand %p1232_p8, %p1220_p6  ;;  %p1240_p12 = scmp.lt.s32.totalorder %s1238_s26, %s1231_s9 }
  0x2d   : > { %p1235_p11 = pneg %p1234_p9  ;;  %p1241_p13 = por %p1240_p12, %p1239_p7 }
  0x2f   : > { %p1242_p0 = pnand %p1241_p13, %p1235_p11 }
  0x31   : > { %1245 = shalt.err (!%p1242_p0)
}
  0x32   : > { %s1369_s12 = smov 256   ;;  %s1370_s10 = smov 16  }
  0x33   : > { %1086 = dma.hbm_to_vmem [thread:$0]  (!%p1527_p5), %s261_s20, 512, %s263_s6, %s243_s11, %s1369_s12, %s1369_s12, %s1370_s10  }
  0x34   : > { %p982_p2 = scmp.ge.s32.totalorder %s1366_s28, 1  ;;  %p306_p3 = scmp.lt.s32.totalorder %s1366_s28, 13 }
  0x36   : > { %p307_p6 = pnand %p982_p2, %p306_p3 }
  0x37   : > { %s312_s8 = sand.u32 (!%p307_p6), 1, %s1342_s22  }
  0x38   : > { %310 = sbr.rel (%p307_p6) target bundleno = 761 (0x2f9), region = 40  ;;  %s983_s17 = sshll.u32 (!%p307_p6), %s312_s8, 5 }
  0x39   : > { %s313_s29 = scalar_lea.sflag (!%p307_p6), [#allocation5], %s312_s8  ;;  %s1541_s21 = scalar_lea.vmem (!%p307_p6), [#allocation4], %s983_s17 }
  0x3d   : > { %1317 = dma.done.wait (%p1494_p10), %s313_s29, 512  }
  0x3e   : > { %1319 = vsyncadd (%p1494_p10), %s313_s29, 4294966784  ;;  %s361_s20 = sand.u32 1, %s1330_s19   ;;  %s985_s30 = sadd.s32 4294967294, %s1350_s24 }
  0x3f   : > { %s984_s6 = sshll.u32 %s361_s20, 5  ;;  %p381_p5 = scmp.gt.s32.totalorder %s985_s30, 0 }
  0x40   : > { %p986_p8 = scmp.lt.s32.totalorder %s985_s30, 3  ;;  %s1559_s16 = scalar_lea.vmem [#allocation7], %s984_s6 }
  0x41   : > { %s1757_s30 = smov (!%p381_p5, %s985_s30), 0  ;;  %p992_p10 = scmp.ge.s32.totalorder %s1350_s24, 2 }
  0x42   : > { %s1039_s11 = scalar_select %p986_p8, %s1757_s30, 3 }
  0x43   : > { %406 = sbr.rel (%p992_p10) target bundleno = 307 (0x133), region = 48  ;;  %p586_p9 = scmp.lt.s32.totalorder (!%p992_p10), %s1350_s24, 1 }
  0x44   : > { %s1077_s14 = smul.u32 56, %s1039_s11 }
  0x46   : > { %s1557_s15 = scalar_lea.vmem %s1716_s4, %s1077_s14 }
  0x48   : > { %v1188_v0 = vld [vmem:[%s1713_s1 + $0x78] sm:$0xff]   ;;  %v1190_v2 = vld [vmem:[%s1713_s1 + $0x70] sm:$0xff]   ;;  %v1192_v4 = vld [vmem:[%s1713_s1 + $0x68] sm:$0xff]   ;;  %s587_s9 = scalar_select %p586_p9, %s1350_s24, 1  ;;  %vm594_vm0 = vcmask 457728  }
  0x49   : > { %v1189_v1 = vld [vmem:[%s1713_s1 + $0x38] sm:$0xff]   ;;  %1044 = vmatprep.subr.bf16.mxu0 %v1188_v0  ;;  %v1191_v3 = vld [vmem:[%s1713_s1 + $0x30] sm:$0xff]   ;;  %v1193_v5 = vld [vmem:[%s1713_s1 + $0x28] sm:$0xff]  }
  0x4a   : > { %1045 = vmatpush3.bf16.msra.mxu0 %v1189_v1  ;;  %v1194_v6 = vld [vmem:[%s1713_s1 + $0x60] sm:$0xff]   ;;  %v1196_v8 = vld [vmem:[%s1713_s1 + $0x58] sm:$0xff]   ;;  %v1198_v10 = vld [vmem:[%s1713_s1 + $0x50] sm:$0xff]   ;;  %s1009_s7 = sshll.u32 %s587_s9, 4 }
  0x4b   : > { %1046 = vmatprep.subr.bf16.mxu0 %v1190_v2  ;;  %v1195_v7 = vld [vmem:[%s1713_s1 + $0x20] sm:$0xff]   ;;  %v1197_v9 = vld [vmem:[%s1713_s1 + $0x18] sm:$0xff]   ;;  %v408_v11 = vld [vmem:[%s1541_s21 + $0x8] sm:$0xff]  ;;  %s593_s26 = scalar_lea.vmem [#allocation2], %s1009_s7 }
  0x4c   : > { %v410_v12 = vld [vmem:[%s1541_s21 + $0x18] sm:$0xff]  ;;  %v407_v13 = vld [vmem:[%s1541_s21] sm:$0xff]  ;;  %412 = vst [vmem:[%s1559_s16 + $0x8] sm:$0xff] %v408_v11  ;;  %v409_v15 = vld [vmem:[%s1541_s21 + $0x10] sm:$0xff] }
  0x4d   : > { %414 = vst [vmem:[%s1559_s16 + $0x18] sm:$0xff] %v410_v12  ;;  %v416_v14 = vpack.c.bf16 %v410_v12, %v408_v11  ;;  %411 = vst [vmem:[%s1559_s16] sm:$0xff] %v407_v13  ;;  %v1199_v16 = vld [vmem:[%s1713_s1 + $0x10] sm:$0xff]   ;;  %v1200_v17 = vld [vmem:[%s1713_s1 + $0x48] sm:$0xff]   ;;  %v415_v21 = vpack.c.bf16 %v409_v15, %v407_v13 }
  0x4e   : > { %1047 = vmatpush3.bf16.msra.mxu0 %v1191_v3  ;;  %413 = vst [vmem:[%s1559_s16 + $0x10] sm:$0xff] %v409_v15  ;;  %v1201_v18 = vld [vmem:[%s1713_s1 + $0x8] sm:$0xff]   ;;  %v1202_v19 = vld [vmem:[%s1713_s1 + $0x40] sm:$0xff]  }
  0x4f   : > { %1048 = vmatprep.subr.bf16.mxu0 %v1192_v4  ;;  %577 = vmatprep.mubr.bf16.mxu0 %v416_v14  ;;  %v1203_v20 = vld [vmem:[%s1713_s1] sm:$0xff]  }
  0x52   : > { %1049 = vmatpush3.bf16.msra.mxu0 %v1193_v5 }
  0x53   : > { %1050 = vmatprep.subr.bf16.mxu0 %v1194_v6 }
  0x56   : > { %1051 = vmatpush3.bf16.msra.mxu0 %v1195_v7 }
  0x57   : > { %1052 = vmatprep.subr.bf16.mxu0 %v1196_v8 }
  0x5a   : > { %1053 = vmatpush3.bf16.msra.mxu0 %v1197_v9 }
  0x5b   : > { %1054 = vmatprep.subr.bf16.mxu0 %v1198_v10 }
  0x5e   : > { %1055 = vmatpush3.bf16.msra.mxu0 %v1199_v16 }
  0x5f   : > { %1056 = vmatprep.subr.bf16.mxu0 %v1200_v17 }
  0x62   : > { %1057 = vmatpush3.bf16.msra.mxu0 %v1201_v18 }
  0x63   : > { %1058 = vmatprep.subr.bf16.mxu0 %v1202_v19 }
  0x66   : > { %1059 = vmatpush3.bf16.msra.mxu0 %v1203_v20 }
  0x69   : > { %578 = vmatmul.mubr.bf16.vlgmr.msra.gmra.mxu0 %v415_v21 }
 0x129   : > { %v1060_v22 = vpop.f32.mrf.mxu0 }
 0x12b   : > { %v1061_v23 = vpop.f32.mrf.mxu0 }
 0x12c   : > { %v1062_v24 = vadd.f32 %v1061_v23, %v1060_v22 }
 0x12d   : > { %v1063_v25 = vpop.f32.mrf.mxu0 }
 0x12e   : > { %595 = vst.msk [vmem:[%s593_s26] sm:$0xff] %vm594_vm0, %v1062_v24 }
 0x12f   : > { %v1064_v26 = vpop.f32.mrf.mxu0 }
 0x130   : > { %v1065_v27 = vadd.f32 %v1064_v26, %v1063_v25 }
 0x132   : > { %596 = vst.msk [vmem:[%s593_s26 + $0x8] sm:$0xff] %vm594_vm0, %v1065_v27 }
 0x133 PF: > { %p1011_p11 = scmp.lt.s32.totalorder %s1350_s24, 2 }
 0x134   : > { %s1040_s12 = sshll.u32 (!%p1011_p11), %s1757_s30, 3  ;;  %s1015_s29 = sshll.u32 (!%p1011_p11), %s1757_s30, 4 }
 0x135   : > { %613 = sbr.rel (%p1011_p11) target bundleno = 735 (0x2df), region = 60  ;;  %s629_s17 = scalar_lea.vmem (!%p1011_p11), %s1714_s2, %s1040_s12 }
 0x136   : > { %s633_s6 = scalar_lea.vmem (!%p1011_p11), %s1715_s3, %s1015_s29 }
 0x13a   : > { %v623_v28 = vld [vmem:[#allocation2 + $0x10] sm:$0xff]  ;;  %v624_v29 = vld [vmem:[#allocation2 + $0x18] sm:$0xff]  ;;  %v621_v30 = vld [vmem:[#allocation2] sm:$0xff]  ;;  %v1371_v31 = vmov 0.0   ;;  %vm1372_vm1 = vmmov 0   ;;  %v1373_v34 = vmov 0  }
 0x13b   : > { %1069 = vmatprep.subr.bf16.mxu0 %v1371_v31  ;;  %v626_v32 = vpack.c.bf16 %v624_v29, %v623_v28  ;;  %v622_v33 = vld [vmem:[#allocation2 + $0x8] sm:$0xff]  ;;  %1073 = vmatprep.mubr.msk.bf16.mxu0 %vm1372_vm1, %v1371_v31  ;;  %v634_v36 = vld [vmem:[%s633_s6] sm:$0xff]  ;;  %vm651_vm2 = vcmask 261120   ;;  %v717_v39 = vld [vmem:[%s1557_s15 + $0x30] sm:$0xff]  ;;  %vm762_vm3 = vcmask 1043456   ;;  %vm706_vm4 = vcmask 453632  }
 0x13c   : > { %1204 = vset.pattern.permute.xlu0 %v1373_v34  ;;  %801 = vmatprep.mubr.bf16.mxu1 %v1373_v34  ;;  %v625_v35 = vpack.c.bf16 %v622_v33, %v621_v30  ;;  %v635_v37 = vld [vmem:[%s633_s6 + $0x8] sm:$0xff]  ;;  %v1205_v38 = vld [vmem:[%s629_s17] sm:$0xff]   ;;  %v1028_v40 = vcombine.high %v717_v39, %v717_v39  ;;  %v1027_v41 = vcombine.low %v717_v39, %v717_v39  ;;  %v1211_v45 = vld [vmem:[%s1557_s15 + $0x14] ss:$8 sps:$4 sm:$0xff]   ;;  %vm758_vm5 = vcmask 457728  }
 0x13d   : > { %1070 = vmatpush3.bf16.msra.mxu0 %v626_v32  ;;  %638 = vperm.xlu0 %1204, %v634_v36   ;;  %v1208_v43 = vld [vmem:[%s1557_s15 + $0x24] ss:$8 sps:$4 sm:$0xff]   ;;  %v1210_v44 = vld [vmem:[%s1557_s15 + $0x20] ss:$8 sps:$4 sm:$0xff]   ;;  %v1213_v46 = vld [vmem:[%s1557_s15 + $0x10] ss:$8 sps:$4 sm:$0xff]  }
 0x13e   : > { %1071 = vmatprep.subr.bf16.mxu0 %v1371_v31  ;;  %1029 = vmatprep.subr.msk.bf16.mxu1 %vm762_vm3, %v1028_v40  ;;  %v764_v42 = vsel %vm762_vm3, %v1027_v41, 0  ;;  %v1214_v47 = vld [vmem:[%s1557_s15 + $0x4] ss:$8 sps:$4 sm:$0xff]   ;;  %v1216_v48 = vld [vmem:[%s1557_s15] ss:$8 sps:$4 sm:$0xff]  }
 0x13f   : > { %778 = vmatpush1.bf16.msra.mxu1 %v764_v42 }
 0x140   : > { %779 = vmatprep.subr.bf16.mxu1 %v1208_v43 }
 0x141   : > { %1072 = vmatpush3.bf16.msra.mxu0 %v625_v35  ;;  %643 = vperm.xlu0 %1204, %v635_v37  }
 0x143   : > { %780 = vmatpush1.bf16.msra.mxu1 %v1210_v44 }
 0x144   : > { %1074 = vmatmul.mubr.msk.bf16.vlgmr.msra.gmra.mxu0 %vm651_vm2, %v1205_v38  ;;  %781 = vmatprep.subr.bf16.mxu1 %v1211_v45 }
 0x147   : > { %782 = vmatpush1.bf16.msra.mxu1 %v1213_v46 }
 0x148   : > { %783 = vmatprep.subr.bf16.mxu1 %v1214_v47 }
 0x14b   : > { %784 = vmatpush1.bf16.msra.mxu1 %v1216_v48 }
 0x1b8   : > { %v639_v49 = vpop.permute.xlu0 %638 }
 0x1bc   : > { %v644_v54 = vpop.permute.xlu0 %643 }
 0x204   : > { %v689_v50 = vpop.f32.mrf.mxu0 }
 0x205   : > { %v690_v51 = vadd.f32 %v689_v50, %v639_v49 }
 0x206   : > { %v1075_v52 = vpop.f32.mrf.mxu0 }
 0x207   : > { %v696_v53 = vmax.f32 %v690_v51, 0.0 }
 0x208   : > { %v692_v55 = vpop.f32.mrf.mxu0 }
 0x209   : > { %v1041_v56 = vpack.c.bf16 %v696_v53, %v696_v53  ;;  %v693_v57 = vadd.f32 %v692_v55, %v644_v54 }
 0x20a   : > { %v1076_v58 = vpop.f32.mrf.mxu0 }
 0x20b   : > { %707 = vst.msk [vmem:[#allocation3] sm:$0xf] %vm706_vm4, %v1041_v56  ;;  %v697_v59 = vmax.f32 %v693_v57, 0.0 }
 0x20d   : > { %v1042_v60 = vpack.c.bf16 %v697_v59, %v697_v59 }
 0x20f   : > { %708 = vst.msk [vmem:[#allocation3 + $0x4] sm:$0xf] %vm706_vm4, %v1042_v60 }
 0x216   : > { %v1217_v61 = vld [vmem:[#allocation3] sm:$0xff]  }
 0x217   : > { %1030 = vmatmul.mubr.msk.bf16.vlgmr.msra.gmra.mxu1 %vm758_vm5, %v1217_v61 }
 0x2d7   : > { %v803_v62 = vpop.f32.mrf.mxu1 }
 0x2d8   : > { %812 = vst [vmem:[%s1559_s16] sm:$0xff] %v803_v62 }
 0x2d9   : > { %v805_v63 = vpop.f32.mrf.mxu1 }
 0x2da   : > { %813 = vst [vmem:[%s1559_s16 + $0x8] sm:$0xff] %v805_v63 }
 0x2db   : > { %v807_v0 = vpop.f32.mrf.mxu1 }
 0x2dc   : > { %814 = vst [vmem:[%s1559_s16 + $0x10] sm:$0xff] %v807_v0 }
 0x2dd   : > { %v809_v1 = vpop.f32.mrf.mxu1 }
 0x2de   : > { %815 = vst [vmem:[%s1559_s16 + $0x18] sm:$0xff] %v809_v1 }
 0x2df PF: > { %s1043_s30 = sshll.u32 %s1350_s24, 2  ;;  %s1078_s15 = smul.u32 24, %s1354_s25 }
 0x2e0   : > { %s835_s14 = sshll.u32 %s1559_s16, 4  ;;  %s1652_s8 = scalar_lea.sflag [#allocation6], %s361_s20  ;;  %s1643_s14 = int_to_ptr.vmem [resolvable:$true] %s835_s14 }
 0x2e1   : > { %s832_s9 = sadd.s32 %s1078_s15, %s1043_s30  ;;  %s1246_s17 = scalar_lea.vmem %s1643_s14, 512 }
 0x2e2   : > { %s1034_s7 = sshll.u32 %s832_s9, 7  ;;  %p1247_p7 = scmp.ne.s32.totalorder %s1643_s14, %s1246_s17 }
 0x2e3   : > { %s1648_s10 = scalar_lea.hbm %s1717_s5, %s1034_s7  ;;  %s1374_s24 = smov [#allocation7]  }
 0x2e4   : > { %p1248_p12 = pnand %p1247_p7, %p1511_p1  ;;  %s1250_s25 = sshll.u32 %s1374_s24, 4  ;;  %s1251_s25 = int_to_ptr.vmem [resolvable:$false] %s1250_s25 }
 0x2e5   : > { %s1252_s16 = scalar_lea.vmem %s1251_s25, 1024  ;;  %p1253_p0 = scmp.lt.s32.totalorder %s1643_s14, %s1251_s25 }
 0x2e6   : > { %p1249_p13 = pneg %p1248_p12  ;;  %p1254_p2 = scmp.lt.s32.totalorder %s1252_s16, %s1246_s17 }
 0x2e8   : > { %p1255_p3 = por %p1254_p2, %p1253_p0 }
 0x2ea   : > { %p1256_p6 = pnand %p1255_p3, %p1249_p13 }
 0x2ec   : > { %1259 = shalt.err (!%p1256_p6)
}
 0x2ed   : > { %s1260_s20 = scalar_lea.hbm %s1648_s10, 512  ;;  %s1264_s11 = scalar_lea.hbm %s1717_s5, 6144 }
 0x2ee   : > { %p1261_p5 = scmp.ne.s32.totalorder %s1648_s10, %s1260_s20  ;;  %p1265_p9 = scmp.lt.s32.totalorder %s1648_s10, %s1717_s5 }
 0x2ef   : > { %p1266_p11 = scmp.lt.s32.totalorder %s1264_s11, %s1260_s20 }
 0x2f0   : > { %p1262_p8 = pnand %p1261_p5, %p1511_p1 }
 0x2f1   : > { %p1267_p7 = por %p1266_p11, %p1265_p9 }
 0x2f2   : > { %p1263_p10 = pneg %p1262_p8 }
 0x2f4   : > { %p1268_p12 = pnand %p1267_p7, %p1263_p10 }
 0x2f6   : > { %1271 = shalt.err (!%p1268_p12)
}
 0x2f7   : > { %s1375_s15 = smov 256   ;;  %s1376_s9 = smov 16  }
 0x2f8   : > { %1081 = dma.vmem_to_hbm [thread:$0]  (%p1511_p1), %s1643_s14, 512, %s1648_s10, %s1652_s8, %s1375_s15, %s1375_s15, %s1376_s9  }
 0x2f9 PF: > { %p1092_p13 = scmp.ge.s32.totalorder %s1366_s28, 2  ;;  %s850_s26 = sand.u32 1, %s1326_s18  }
 0x2fa   : > { %s851_s12 = scalar_lea.sflag [#allocation6], %s850_s26 }
 0x2fb   : > { %p1088_p0 = pnand %p1092_p13, %p1518_p4 }
 0x2fd   : > { %p1089_p2 = pneg %p1088_p0 }
 0x2ff   : > { %1321 = dma.done.wait (%p1089_p2), %s851_s12, 512  }
 0x300   : > { %1323 = vsyncadd (%p1089_p2), %s851_s12, 4294966784  ;;  %s21_s28 = sadd.s32 1, %s1366_s28   ;;  %s1737_s17 = sld [smem:[#allocation10_spill]] }
 0x301   : > { %p18_p3 = scmp.ge.s32.totalorder %s21_s28, 14   ;;  %s1738_s20 = sld [smem:[#allocation15_spill]] }
 0x302   : > { %s1739_s13 = sld [smem:[#allocation14_spill]]  ;;  %s1743_s18 = smov %s1330_s19 }
 0x303   : > { %s1740_s24 = sld [smem:[#allocation11_spill]]  ;;  %s1745_s21 = smov %s1342_s22 }
 0x304   : > { %s1741_s26 = sld [smem:[#allocation12_spill]]  ;;  %s1746_s22 = smov %s1346_s23 }
 0x305   : > { %s1742_s14 = sld [smem:[#allocation13_spill]]  ;;  %s1748_s25 = smov %s1362_s27 }
 0x306   : > { %s1744_s19 = smov %s1737_s17 }
 0x307   :  { %20 = sbr.rel (!%p18_p3) target bundleno = 9 (0x9), region = 115 }
 0x308   : > { %s1747_s23 = smov %s1739_s13 }
 0x30b   : > { %s1749_s27 = smov %s1742_s14 }
 0x30c   :  { %856 = vsyncpa [#allocation5], 1 }
 0x30d   :  { %858 = vsyncpa [#allocation5 + $0x1], 1 }
 0x30e   :  { %859 = vsyncpa [#allocation6], 1 }
 0x30f   :  { %861 = vsyncpa [#allocation6 + $0x1], 1 }

</bundles_post_ra>
